<compile_context>
chip_gen: v7x
topology: tpu7x:2x2x1
jax: 0.10.0
libtpu: 0.0.40
codegen_flags: <defaults>
</compile_context>

<pallas_src>
import jax
import jax.numpy as jnp
from jax.experimental import pallas as pl
from jax.experimental.pallas import tpu as pltpu


def _resblock_kernel(x_ref, w_ref, b_ref, xres_ref, o_ref):
    """One (M, tn) output tile; full K reduction in a single grid step.

    x_ref:    (M, K)      bf16, VMEM-resident (same block every step)
    w_ref:    (K, tn)     bf16, tile-major contiguous weight slab (hot DMA)
    b_ref:    (N//tn, tn) f32,  VMEM-resident packed bias
    xres_ref: (M, tn)     f32,  residual input aligned with the output tile
    o_ref:    (M, tn)     output
    """
    j = pl.program_id(0)

    # MXU: bf16 x bf16 -> f32, whole reduction at once.
    y = jnp.dot(x_ref[...], w_ref[...], preferred_element_type=jnp.float32)

    # Bias row j from the resident packed bias (dynamic sublane index).
    y = y + b_ref[pl.ds(j, 1), :]

    # Exact SiLU (epilogue is fully hidden under the weight DMA).
    sig = 1.0 / (1.0 + jnp.exp(-y))
    o_ref[...] = (xres_ref[...].astype(jnp.float32) + y * sig).astype(o_ref.dtype)


def _pick_tile(dim, cap):
    """Largest multiple of 128 that divides `dim` and is <= cap (>= 128)."""
    best = 128
    t = 128
    limit = min(dim, cap)
    while t <= limit:
        if dim % t == 0:
            best = t
        t += 128
    return best


def _default_vmem_limit():
    """Generation-aware scoped VMEM limit: 3/4 of physical per-core VMEM."""
    try:
        cap = int(pltpu.get_tpu_info().vmem_capacity_bytes)
    except Exception:
        cap = 64 * 1024 * 1024  # conservative fallback (v7x per-TC VMEM)
    return (cap * 3) // 4       # v5e/v6e: 96 MiB, v7x: 48 MiB


def choose_resblock_tiles(K, N, *, vmem_limit_bytes=None):
    """Pick tn (output-column tile) and the VMEM limit for this generation.

    Constraints:
      * double-buffered bf16 weight tile (2 * K * tn * 2 bytes) fits in
        roughly half of the VMEM limit,
      * keep N//tn >= 2 (>= 4 for large N) so v7x's two TensorCores both get
        blocks on the parallel axis,
      * tn is a multiple of 128 that divides N (lane-dense output stores).
    """
    if vmem_limit_bytes is None:
        vmem_limit_bytes = _default_vmem_limit()
    w_budget = vmem_limit_bytes // 2
    cap_vmem = max(128, (w_budget // (2 * K * 2)) // 128 * 128)
    if N >= 512:
        cap_cores = N // 4
    elif N >= 256:
        cap_cores = N // 2
    else:
        cap_cores = N
    tn = _pick_tile(N, min(cap_vmem, cap_cores, 2048))
    return tn, vmem_limit_bytes


def prepare_resblock_params(w_torch_layout, b, *, tn):
    """Hoisted, once-per-model weight/bias prep.

    w_torch_layout: [H_out, H_in] (PyTorch nn.Linear weight), b: [H_out].
    Returns:
      w_packed: bf16 [N//tn, H_in, tn]  -- tile-major, so each per-step weight
                DMA is one contiguous HBM read.
      b_packed: f32  [N//tn, tn]        -- kept resident in VMEM by the kernel.
    """
    H_out, H_in = w_torch_layout.shape
    assert H_out % tn == 0 and tn % 128 == 0
    wt = jnp.asarray(w_torch_layout, dtype=jnp.bfloat16).T        # [H_in, H_out]
    w_packed = wt.reshape(H_in, H_out // tn, tn).transpose(1, 0, 2)  # [NT, K, tn]
    b_packed = jnp.asarray(b, dtype=jnp.float32).reshape(H_out // tn, tn)
    return w_packed, b_packed


def resblock_forward(x, x_bf16, w_packed, b_packed, *, vmem_limit_bytes=None):
    """x: [M, H] (residual dtype), x_bf16: [M, H] bf16 (matmul operand),
    w_packed: [N//tn, H, tn] bf16, b_packed: [N//tn, tn] f32.

    Returns x + SiLU(x @ W^T + b), shape [M, N]  (N == H for a ResBlock).
    """
    M, K = x.shape
    NT, Kw, tn = w_packed.shape
    N = NT * tn
    assert Kw == K, "weight inner dim must match hidden size"
    assert N == K, "ResBlock residual requires a square linear layer"
    assert b_packed.shape == (NT, tn)
    assert x_bf16.shape == (M, K) and x_bf16.dtype == jnp.bfloat16
    assert N % 128 == 0 and K % 128 == 0, "hidden size must be a multiple of 128"

    if vmem_limit_bytes is None:
        vmem_limit_bytes = _default_vmem_limit()

    grid = (NT,)  # single 'parallel' axis over output-column tiles (tk == K)

    out = pl.pallas_call(
        _resblock_kernel,
        out_shape=jax.ShapeDtypeStruct((M, N), x.dtype),
        grid_spec=pltpu.PrefetchScalarGridSpec(
            num_scalar_prefetch=0,
            grid=grid,
            in_specs=[
                # x (bf16) for the matmul: whole array, resident (DMA'd once).
                pl.BlockSpec((M, K), lambda j: (0, 0)),
                # tile-major weight: one contiguous (K, tn) slab per step.
                pl.BlockSpec((None, K, tn), lambda j: (j, 0, 0)),
                # packed bias: whole array, resident (DMA'd once).
                pl.BlockSpec((NT, tn), lambda j: (0, 0)),
                # x (f32) aligned with the output tile for the residual add.
                pl.BlockSpec((M, tn), lambda j: (0, j)),
            ],
            out_specs=pl.BlockSpec((M, tn), lambda j: (0, j)),
        ),
        compiler_params=pltpu.CompilerParams(
            dimension_semantics=("parallel",),
            vmem_limit_bytes=vmem_limit_bytes,
        ),
    )(x_bf16, w_packed, b_packed, x)
    return out


def resblock_reference(x, w_torch_layout, b):
    y = x @ w_torch_layout.T + b
    return x + y * jax.nn.sigmoid(y)


if __name__ == "__main__":
    # Small shapes consistent with the module: tokens x hidden into a square
    # Linear(hidden, hidden) with bias (Medusa decode is skinny-M).
    tokens, hidden = 8, 256

    key = jax.random.PRNGKey(0)
    kx, kw, kb = jax.random.split(key, 3)
    x = jax.random.normal(kx, (tokens, hidden), dtype=jnp.float32)
    # Deterministic "FastLinear" params (PyTorch layout: [out, in] weight, [out] bias).
    w = jax.random.normal(kw, (hidden, hidden), dtype=jnp.float32) * 0.02
    b = jax.random.normal(kb, (hidden,), dtype=jnp.float32) * 0.02

    # Once-per-model prep (hoisted out of the per-step path): generation-aware
    # tile choice, tile-major bf16 weight pack, packed f32 bias, bf16 x cast.
    tn, vmem_limit = choose_resblock_tiles(hidden, hidden)
    w_packed, b_packed = prepare_resblock_params(w, b, tn=tn)
    x_bf16 = x.astype(jnp.bfloat16)

    out = jax.block_until_ready(
        resblock_forward(x, x_bf16, w_packed, b_packed, vmem_limit_bytes=vmem_limit)
    )

    # Also exercise the single-tile path (tn == N -> grid of 1, everything resident).
    w_packed_1, b_packed_1 = prepare_resblock_params(w, b, tn=hidden)
    out_single = jax.block_until_ready(
        resblock_forward(x, x_bf16, w_packed_1, b_packed_1, vmem_limit_bytes=vmem_limit)
    )

    ref = resblock_reference(x, w, b)
    assert out.shape == (tokens, hidden)
    # bf16 matmul operands -> slightly looser tolerance vs the f32 reference.
    assert jnp.allclose(out, ref, atol=2e-2, rtol=2e-2), "mismatch vs reference"
    assert jnp.allclose(out_single, ref, atol=2e-2, rtol=2e-2), \
        "mismatch vs reference (single-tile)"

    print("KERNEL_OK")
</pallas_src>

<mosaic_0001>
module attributes {stable_mosaic.version = 11 : i64} {
  func.func @_resblock_kernel(%arg0: i32, %arg1: memref<8x256xbf16, #tpu.memory_space<vmem>>, %arg2: memref<1x256x128xbf16, #tpu.memory_space<vmem>>, %arg3: memref<2x128xf32, #tpu.memory_space<vmem>>, %arg4: memref<8x128xf32, #tpu.memory_space<vmem>>, %arg5: memref<8x128xf32, #tpu.memory_space<vmem>>) attributes {dimension_semantics = [#tpu.dimension_semantics<parallel>], iteration_bounds = array<i64: 2>, scalar_prefetch = 0 : i64, scratch_operands = 0 : i64, tpu.core_type = #tpu.core_type<tc>, window_params = [{pipeline_mode = #tpu.pipeline_mode<synchronous>, transform_indices = @transform_0, window_bounds = array<i64: 8, 256>}, {transform_indices = @transform_1, window_bounds = array<i64: 1, 256, 128>}, {pipeline_mode = #tpu.pipeline_mode<synchronous>, transform_indices = @transform_2, window_bounds = array<i64: 2, 128>}, {transform_indices = @transform_3, window_bounds = array<i64: 8, 128>}, {transform_indices = @transform_4, window_bounds = array<i64: 8, 128>}]} {
    %c0 = arith.constant 0 : index
    %c0_0 = arith.constant 0 : index
    %0 = vector.load %arg1[%c0, %c0_0] : memref<8x256xbf16, #tpu.memory_space<vmem>>, vector<8x256xbf16>
    %c0_1 = arith.constant 0 : index
    %c0_2 = arith.constant 0 : index
    %c0_3 = arith.constant 0 : index
    %1 = vector.load %arg2[%c0_1, %c0_2, %c0_3] : memref<1x256x128xbf16, #tpu.memory_space<vmem>>, vector<1x256x128xbf16>
    %2 = vector.shape_cast %1 : vector<1x256x128xbf16> to vector<256x128xbf16>
    %cst = arith.constant dense<0.000000e+00> : vector<8x128xf32>
    %3 = tpu.matmul %0, %2, %cst {dimension_numbers = #tpu.dot_dimension_numbers<[1], [0], [0], [1], [0, 0, 1, 1], [], []>} : vector<8x256xbf16>, vector<256x128xbf16>, vector<8x128xf32> -> vector<8x128xf32>
    %4 = arith.index_cast %arg0 : i32 to index
    %c0_4 = arith.constant 0 : index
    %5 = vector.load %arg3[%4, %c0_4] : memref<2x128xf32, #tpu.memory_space<vmem>>, vector<1x128xf32>
    %6 = vector.broadcast %5 : vector<1x128xf32> to vector<8x128xf32>
    %7 = arith.addf %3, %6 : vector<8x128xf32>
    %cst_5 = arith.constant 0.000000e+00 : f32
    %8 = vector.broadcast %cst_5 : f32 to vector<8x128xf32>
    %9 = arith.subf %8, %7 : vector<8x128xf32>
    %10 = math.exp %9 : vector<8x128xf32>
    %cst_6 = arith.constant 1.000000e+00 : f32
    %11 = vector.broadcast %cst_6 : f32 to vector<8x128xf32>
    %12 = arith.addf %11, %10 : vector<8x128xf32>
    %cst_7 = arith.constant 1.000000e+00 : f32
    %13 = vector.broadcast %cst_7 : f32 to vector<8x128xf32>
    %14 = arith.divf %13, %12 : vector<8x128xf32>
    %c0_8 = arith.constant 0 : index
    %c0_9 = arith.constant 0 : index
    %15 = vector.load %arg4[%c0_8, %c0_9] : memref<8x128xf32, #tpu.memory_space<vmem>>, vector<8x128xf32>
    %16 = arith.mulf %7, %14 : vector<8x128xf32>
    %17 = arith.addf %15, %16 : vector<8x128xf32>
    %c0_10 = arith.constant 0 : index
    %c0_11 = arith.constant 0 : index
    %18 = vector.load %arg5[%c0_10, %c0_11] : memref<8x128xf32, #tpu.memory_space<vmem>>, vector<8x128xf32>
    tpu.vector_store %arg5[%c0_10, %c0_11], %17 {strides = array<i32>} : memref<8x128xf32, #tpu.memory_space<vmem>>, vector<8x128xf32>,
    return
  }
  func.func @transform_0(%arg0: i32) -> (i32, i32) {
    %c0_i32 = arith.constant 0 : i32
    %c0_i32_0 = arith.constant 0 : i32
    %c0_i32_1 = arith.constant 0 : i32
    return %c0_i32, %c0_i32_0 : i32, i32
  }
  func.func @transform_1(%arg0: i32) -> (i32, i32, i32) {
    %c0_i32 = arith.constant 0 : i32
    %c0_i32_0 = arith.constant 0 : i32
    %c0_i32_1 = arith.constant 0 : i32
    return %arg0, %c0_i32, %c0_i32_0 : i32, i32, i32
  }
  func.func @transform_2(%arg0: i32) -> (i32, i32) {
    %c0_i32 = arith.constant 0 : i32
    %c0_i32_0 = arith.constant 0 : i32
    %c0_i32_1 = arith.constant 0 : i32
    return %c0_i32, %c0_i32_0 : i32, i32
  }
  func.func @transform_3(%arg0: i32) -> (i32, i32) {
    %c0_i32 = arith.constant 0 : i32
    %c0_i32_0 = arith.constant 0 : i32
    return %c0_i32, %arg0 : i32, i32
  }
  func.func @transform_4(%arg0: i32) -> (i32, i32) {
    %c0_i32 = arith.constant 0 : i32
    %c0_i32_0 = arith.constant 0 : i32
    return %c0_i32, %arg0 : i32, i32
  }
}

</mosaic_0001>

<bundles_post_ra>
// kernel: tpu_custom_call.1
= control target key start
LH: loop header
LB: loop body
LE: loop exit
PB: predicated region body
PF: predicated region fallthrough
CT: control target
= control target key end

     0   :  { %9 = vsyncpa [#allocation3], 0  ;;  %s1167_s0 = inlined_call_operand.hbm [shape: bf16[8,256], index: 0, kind: input, shape index: {}]   ;;  %s1168_s1 = inlined_call_operand.hbm [shape: bf16[2,256,128], index: 1, kind: input, shape index: {}]   ;;  %s1169_s2 = inlined_call_operand.vmem [shape: f32[2,128], index: 2, kind: input, shape index: {}]   ;;  %s1170_s3 = inlined_call_operand.hbm [shape: f32[8,256], index: 3, kind: input, shape index: {}]   ;;  %s1171_s4 = inlined_call_operand.hbm [shape: f32[8,256], index: 4, kind: output, shape index: {}]  }
   0x1   :  { %10 = vsyncpa [#allocation6], 0 }
   0x2   :  { %12 = vsyncpa [#allocation6 + $0x1], 0 }
   0x3   :  { %13 = vsyncpa [#allocation4], 0 }
   0x4   :  { %15 = vsyncpa [#allocation4 + $0x1], 0  ;;  %s910_s15 = smov 0   ;;  %s912_s16 = smov 0  }
   0x5   :  { %s914_s17 = smov 0   ;;  %s916_s18 = smov 0  }
   0x6 LB: > { %s931_s19 = sadd.s32 1, %s877_s18   ;;  %s49_s20 = sadd.s32 1, %s873_s17  ;;  %s877_s18 = sphi %s916_s18, %s1194_s18   ;;  %s873_s17 = sphi %s914_s17, %s1193_s17   ;;  %s869_s16 = sphi %s912_s16, %s1192_s16   ;;  %s865_s15 = sphi %s910_s15, %s1191_s15  }
   0x7   : > { %s46_s21 = ssub.s32 %s877_s18, %s931_s19  ;;  %p56_p0 = scmp.ne.s32.totalorder %s873_s17, %s869_s16 }
   0x8   : > { %p47_p1 = scmp.eq.s32.totalorder %s46_s21, 0  ;;  %p57_p2 = scmp.eq.s32.totalorder %s877_s18, 0 }
   0x9   : > { %p659_p4 = scmp.lt.s32.totalorder %s877_s18, 2  ;;  %s173_s23 = sand.u32 1, %s877_s18  }
   0xa   : > { %s942_s22 = scalar_select %p47_p1, %s873_s17, %s49_s20  }
   0xb   : > { %p58_p5 = por %p57_p2, %p56_p0  ;;  %s175_s24 = sand.u32 1, %s873_s17  }
   0xc   : > { %s577_s25 = sshll.u32 %s175_s24, 7  ;;  %s610_s26 = sshll.u32 %s877_s18, 11 }
   0xd   : > { %s955_s29 = scalar_lea.hbm %s1168_s1, %s610_s26  ;;  %s177_s30 = scalar_lea.vmem [#allocation5], %s577_s25 }
   0xe   : > { %s184_s5 = sshll.u32 %s177_s30, 4  ;;  %p957_p6 = pnand %p659_p4, %p58_p5  ;;  %s961_s5 = int_to_ptr.vmem [resolvable:$true] %s184_s5 }
   0xf   : > { %s963_s7 = scalar_lea.sflag [#allocation6], %s173_s23  ;;  %s719_s8 = scalar_lea.hbm %s955_s29, 2048 }
  0x10   : > { %p720_p7 = scmp.ne.s32.totalorder %s955_s29, %s719_s8  ;;  %p721_p8 = pneg %p957_p6 }
  0x11   : > { %s724_s11 = scalar_lea.hbm %s1168_s1, 4096  ;;  %p725_p11 = scmp.lt.u32.totalorder %s955_s29, %s1168_s1 }
  0x12   : > { %p722_p9 = pnand %p721_p8, %p720_p7  ;;  %p726_p12 = scmp.lt.u32.totalorder %s724_s11, %s719_s8 }
  0x13   : > { %p728_p1 = scmp.lt.u32.totalorder %s719_s8, %s955_s29 }
  0x14   : > { %p723_p10 = pneg %p722_p9  ;;  %p727_p13 = por %p726_p12, %p725_p11 }
  0x16   : > { %p729_p2 = por %p728_p1, %p727_p13 }
  0x18   : > { %p730_p4 = pnand %p729_p2, %p723_p10 }
  0x1a   : > { %733 = shalt.err (!%p730_p4)
}
  0x1b   : > { %s734_s14 = scalar_lea.vmem %s961_s5, 2048  ;;  %s879_s20 = smov [#allocation5]  }
  0x1c   : > { %p735_p5 = scmp.ne.s32.totalorder %s961_s5, %s734_s14  ;;  %s739_s21 = sshll.u32 %s879_s20, 4  ;;  %s740_s21 = int_to_ptr.vmem [resolvable:$false] %s739_s21 }
  0x1d   : > { %s741_s23 = scalar_lea.vmem %s740_s21, 4096  ;;  %p742_p3 = scmp.lt.s32.totalorder %s961_s5, %s740_s21 }
  0x1e   : > { %p737_p7 = pnand %p735_p5, %p721_p8  ;;  %p743_p11 = scmp.lt.s32.totalorder %s741_s23, %s734_s14 }
  0x20   : > { %p738_p9 = pneg %p737_p7  ;;  %p744_p12 = por %p743_p11, %p742_p3 }
  0x22   : > { %p745_p13 = pnand %p744_p12, %p738_p9 }
  0x24   : > { %748 = shalt.err (!%p745_p13)
}
  0x25   : > { %s880_s25 = smov 64   ;;  %s881_s26 = smov 4  }
  0x26   : > { %650 = dma.hbm_to_vmem [thread:$0]  (!%p957_p6), %s955_s29, 2048, %s961_s5, %s963_s7, %s880_s25, %s880_s25, %s881_s26  }
  0x27   : > { %s992_s27 = sadd.s32 4294967295, %s877_s18   ;;  %s573_s28 = sadd.s32 4294967294, %s877_s18  }
  0x28   : > { %p62_p3 = scmp.ne.s32.totalorder %s869_s16, %s865_s15  ;;  %p1172_p10 = scmp.eq.s32.totalorder %s992_s27, 0 }
  0x29   : > { %p133_p1 = scmp.eq.s32.totalorder %s992_s27, 1  ;;  %p139_p2 = scmp.eq.s32.totalorder %s573_s28, 1 }
  0x2a   : > { %p1001_p4 = por %p1172_p10, %p62_p3  ;;  %p574_p5 = scmp.ge.s32.totalorder %s877_s18, 1 }
  0x2b   : > { %p1009_p7 = por %p133_p1, %p56_p0  ;;  %p1013_p9 = por %p139_p2, %p62_p3 }
  0x2c   : > { %s1178_s30 = scalar_select %p1001_p4, 1, 0 }
  0x2d   : > { %s1179_s29 = scalar_select %p1009_p7, 1, 0 }
  0x2e   : > { %s1180_s5 = scalar_select %p1013_p9, 1, 0 }
  0x2f   : > { %p146_p11 = scmp.lt.s32.totalorder %s877_s18, 3  ;;  %s580_s8 = sshll.u32 %s175_s24, 3 }
  0x30   : > { %s882_s10 = smov [#allocation2]   ;;  %s581_s12 = sshll.u32 %s877_s18, 7 }
  0x31   : > { %p1020_p12 = pnand %p574_p5, %p146_p11  ;;  %s159_s11 = sshll.u32 %s882_s10, 4  ;;  %s1024_s11 = int_to_ptr.vmem [resolvable:$true] %s159_s11 }
  0x32   : > { %s1032_s20 = scalar_lea.hbm %s1170_s3, %s581_s12  ;;  %s198_s24 = scalar_lea.vmem [#allocation7], %s580_s8 }
  0x33   : > { %s1181_s9 = scalar_select %p1020_p12, 1, 0 }
  0x34   : > { %p643_p0 = pneg %p1020_p12  ;;  %s205_s21 = sshll.u32 %s198_s24, 4  ;;  %s206_s21 = int_to_ptr.vmem [resolvable:$true] %s205_s21 }
  0x35   : > { %s749_s25 = scalar_lea.hbm %s1032_s20, 128  ;;  %s754_s10 = scalar_lea.hbm %s1170_s3, 256 }
  0x36   : > { %p1036_p13 = pnand %p643_p0, %p1172_p10  ;;  %p750_p3 = scmp.ne.s32.totalorder %s1032_s20, %s749_s25 }
  0x37   : > { %p755_p5 = scmp.lt.u32.totalorder %s1032_s20, %s1170_s3  ;;  %p756_p11 = scmp.lt.u32.totalorder %s754_s10, %s749_s25 }
  0x38   : > { %s1182_s23 = scalar_select %p1036_p13, 1, 0 }
  0x39   : > { %p752_p1 = pnand %p750_p3, %p721_p8  ;;  %p757_p0 = por %p756_p11, %p755_p5 }
  0x3a   : > { %p758_p10 = scmp.lt.u32.totalorder %s749_s25, %s1032_s20 }
  0x3b   : > { %p753_p2 = pneg %p752_p1 }
  0x3c   : > { %p759_p9 = por %p758_p10, %p757_p0 }
  0x3e   : > { %p760_p7 = pnand %p759_p9, %p753_p2 }
  0x40   : > { %763 = shalt.err (!%p760_p7)
}
  0x41   : > { %s764_s8 = scalar_lea.vmem %s206_s21, 128  ;;  %s883_s14 = smov [#allocation7]  }
  0x42   : > { %p765_p4 = scmp.ne.s32.totalorder %s206_s21, %s764_s8  ;;  %s769_s24 = sshll.u32 %s883_s14, 4  ;;  %s770_s24 = int_to_ptr.vmem [resolvable:$false] %s769_s24 }
  0x43   : > { %s771_s26 = scalar_lea.vmem %s770_s24, 256  ;;  %p772_p12 = scmp.lt.s32.totalorder %s206_s21, %s770_s24 }
  0x44   : > { %p767_p3 = pnand %p765_p4, %p721_p8  ;;  %p773_p13 = scmp.lt.s32.totalorder %s771_s26, %s764_s8 }
  0x46   : > { %p768_p1 = pneg %p767_p3  ;;  %p774_p5 = por %p773_p13, %p772_p12 }
  0x48   : > { %p775_p11 = pnand %p774_p5, %p768_p1 }
  0x4a   : > { %778 = shalt.err (!%p775_p11)
}
  0x4b   : > { %653 = dma.hbm_to_vmem [thread:$0]  (!%p957_p6), %s1032_s20, 128, %s206_s21, %s963_s7  }
  0x4c   : > { %s779_s10 = scalar_lea.hbm %s1167_s0, 128  ;;  %p1183_p10 = scmp.ne.s32.totalorder %s1182_s23, 0 }
  0x4d   : > { %p780_p8 = scmp.ne.s32.totalorder %s1167_s0, %s779_s10  ;;  %p786_p12 = scmp.lt.u32.totalorder %s779_s10, %s1167_s0 }
  0x4e   : > { %p781_p4 = pneg %p1183_p10 }
  0x50   : > { %p782_p7 = pnand %p781_p4, %p780_p8 }
  0x52   : > { %p783_p9 = pneg %p782_p7 }
  0x54   : > { %p788_p13 = pnand %p786_p12, %p783_p9 }
  0x56   : > { %791 = shalt.err (!%p788_p13)
}
  0x57   : > { %s792_s6 = scalar_lea.vmem %s1024_s11, 128  ;;  %p800_p3 = scmp.lt.s32.totalorder %s1024_s11, %s1024_s11 }
  0x58   : > { %p793_p6 = scmp.ne.s32.totalorder %s1024_s11, %s792_s6  ;;  %p801_p1 = scmp.lt.s32.totalorder %s792_s6, %s792_s6 }
  0x5a   : > { %p795_p2 = pnand %p793_p6, %p781_p4  ;;  %p802_p5 = por %p801_p1, %p800_p3 }
  0x5c   : > { %p796_p0 = pneg %p795_p2 }
  0x5e   : > { %p803_p11 = pnand %p802_p5, %p796_p0 }
  0x60   : > { %806 = shalt.err (!%p803_p11)
}
  0x61   : > { %646 = dma.hbm_to_vmem [thread:$0]  (!%p1183_p10), %s1167_s0, 128, %s1024_s11, [#allocation3]  }
  0x62   : > { %p1184_p8 = scmp.ne.s32.totalorder %s1181_s9, 0 }
  0x63   : > { %p1185_p7 = scmp.eq.s32.totalorder (!%p1184_p8), %s992_s27, 0 }
  0x64   : > { %214 = sbr.rel (%p1184_p8) target bundleno = 409 (0x199), region = 36 }
  0x6b   : > { %852 = dma.done.wait (%p1185_p7), [#allocation3], 128   ;;  %p1186_p4 = pmov %p1185_p7 }
  0x6c   : > { %s220_s21 = sand.u32 1, %s992_s27   ;;  %s1089_s24 = sand.u32 1, %s869_s16  }
  0x6d   : > { %854 = vsyncadd (%p1186_p4), [#allocation3], 4294967168  ;;  %s584_s23 = sshll.u32 %s1089_s24, 7  ;;  %s221_s26 = scalar_lea.sflag [#allocation6], %s220_s21 }
  0x6e   : > { %s1092_s25 = scalar_lea.vmem [#allocation5], %s584_s23  ;;  %p1187_p10 = scmp.ne.s32.totalorder %s1178_s30, 0 }
  0x70   : > { %856 = dma.done.wait (%p1187_p10), %s221_s26, 2176  }
  0x71   : > { %858 = vsyncadd (%p1187_p10), %s221_s26, 4294965120  ;;  %v697_v0 = vld [vmem:[%s1092_s25 + $0x40] sm:$0xff]   ;;  %v699_v2 = vld [vmem:[%s1092_s25 + $0x48] sm:$0xff]   ;;  %s297_s11 = scalar_lea.vmem %s1169_s2, %s992_s27  ;;  %s585_s28 = sshll.u32 %s1089_s24, 3 }
  0x72   : > { %v698_v1 = vld [vmem:[%s1092_s25] sm:$0xff]   ;;  %611 = vmatprep.subr.bf16.mxu0 %v697_v0  ;;  %v700_v3 = vld [vmem:[%s1092_s25 + $0x8] sm:$0xff]   ;;  %v701_v4 = vld [vmem:[%s1092_s25 + $0x50] sm:$0xff]   ;;  %s233_s10 = scalar_lea.vmem [#allocation7], %s585_s28  ;;  %s607_s12 = sshll.u32 %s992_s27, 7 }
  0x73   : > { %612 = vmatpush3.bf16.msra.mxu0 %v698_v1  ;;  %v702_v5 = vld [vmem:[%s1092_s25 + $0x10] sm:$0xff]   ;;  %v703_v6 = vld [vmem:[%s1092_s25 + $0x58] sm:$0xff]   ;;  %v705_v8 = vld [vmem:[%s1092_s25 + $0x60] sm:$0xff]   ;;  %s262_s13 = scalar_lea.vmem [#allocation8], %s585_s28  ;;  %s1123_s7 = scalar_lea.hbm %s1171_s4, %s607_s12 }
  0x74   : > { %613 = vmatprep.subr.bf16.mxu0 %v699_v2  ;;  %v704_v7 = vld [vmem:[%s1092_s25 + $0x18] sm:$0xff]   ;;  %v706_v9 = vld [vmem:[%s1092_s25 + $0x20] sm:$0xff]   ;;  %v707_v10 = vld [vmem:[%s1092_s25 + $0x68] sm:$0xff]   ;;  %s470_s8 = sshll.u32 %s262_s13, 4  ;;  %s457_s20 = scalar_lea.sflag [#allocation4], %s1089_s24  ;;  %s1125_s8 = int_to_ptr.vmem [resolvable:$true] %s470_s8 }
  0x75   : > { %v264_v11 = vld [vmem:[#allocation2] sm:$0xff]  ;;  %v708_v13 = vld [vmem:[%s1092_s25 + $0x28] sm:$0xff]   ;;  %v709_v14 = vld [vmem:[%s1092_s25 + $0x70] sm:$0xff]   ;;  %s807_s21 = scalar_lea.vmem %s1125_s8, 128  ;;  %p1188_p12 = scmp.ne.s32.totalorder %s1179_s29, 0 }
  0x76   : > { %v589_v12 = vcombine.high %v264_v11, %v264_v11  ;;  %v710_v15 = vld [vmem:[%s1092_s25 + $0x30] sm:$0xff]   ;;  %v711_v16 = vld [vmem:[%s1092_s25 + $0x78] sm:$0xff]   ;;  %v588_v18 = vcombine.low %v264_v11, %v264_v11  ;;  %v452_v31 = vld [vmem:[%s233_s10] sm:$0xff]  ;;  %p808_p9 = scmp.ne.s32.totalorder %s1125_s8, %s807_s21  ;;  %s884_s27 = smov [#allocation8]  }
  0x77   : > { %614 = vmatpush3.bf16.msra.mxu0 %v700_v3  ;;  %v712_v17 = vld [vmem:[%s1092_s25 + $0x38] sm:$0xff]   ;;  %s811_s23 = sshll.u32 %s884_s27, 4  ;;  %s812_s23 = int_to_ptr.vmem [resolvable:$false] %s811_s23 }
  0x78   : > { %615 = vmatprep.subr.bf16.mxu0 %v701_v4  ;;  %438 = vmatprep.mubr.bf16.mxu0 %v589_v12  ;;  %v587_v20 = vld [vmem:[%s297_s11] ss:$0 sm:$0xff]  ;;  %p809_p13 = pnand %p808_p9, %p1188_p12  ;;  %s813_s26 = scalar_lea.vmem %s812_s23, 256 }
  0x79   : > { %p814_p2 = scmp.lt.s32.totalorder %s1125_s8, %s812_s23  ;;  %p815_p0 = scmp.lt.s32.totalorder %s813_s26, %s807_s21 }
  0x7a   : > { %p810_p6 = pneg %p809_p13 }
  0x7b   : > { %616 = vmatpush3.bf16.msra.mxu0 %v702_v5  ;;  %p816_p3 = por %p815_p0, %p814_p2 }
  0x7c   : > { %617 = vmatprep.subr.bf16.mxu0 %v703_v6 }
  0x7d   : > { %p817_p1 = pnand %p816_p3, %p810_p6 }
  0x7f   : > { %618 = vmatpush3.bf16.msra.mxu0 %v704_v7 }
  0x80   : > { %619 = vmatprep.subr.bf16.mxu0 %v705_v8 }
  0x83   : > { %620 = vmatpush3.bf16.msra.mxu0 %v706_v9 }
  0x84   : > { %621 = vmatprep.subr.bf16.mxu0 %v707_v10 }
  0x87   : > { %622 = vmatpush3.bf16.msra.mxu0 %v708_v13 }
  0x88   : > { %623 = vmatprep.subr.bf16.mxu0 %v709_v14 }
  0x8b   : > { %624 = vmatpush3.bf16.msra.mxu0 %v710_v15 }
  0x8c   : > { %625 = vmatprep.subr.bf16.mxu0 %v711_v16 }
  0x8f   : > { %626 = vmatpush3.bf16.msra.mxu0 %v712_v17 }
  0x92   : > { %439 = vmatmul.mubr.bf16.vlgmr.msra.gmra.mrb[0].mxu0 %v588_v18 }
 0x165   : > { %v627_v19 = vpop.f32.mrb[0].mxu0 }
 0x166   : > { %v628_v21 = vpop.f32.mrb[1].mxu0 }
 0x167   : > { %v629_v22 = vadd.f32 %v628_v21, %v627_v19  ;;  %v630_v23 = vpop.f32.mrb[2].mxu0 }
 0x168   : > { %v631_v24 = vpop.f32.mrb[3].mxu0 }
 0x169   : > { %v441_v25 = vadd.f32 %v629_v22, %v587_v20 }
 0x16b   : > { %v446_v26 = vsub.f32 0.0, %v441_v25 }
 0x16d   : > { %v447_v27 = vmul.f32 1.442695, %v446_v26 }
 0x16f   : > { %715 = vpow2.f32 %v447_v27 }
 0x179   : > { %v716_v28 = vpop.eup %715 }
 0x17a   : > { %v449_v29 = vadd.f32 1.0, %v716_v28 }
 0x17c   : > { %717 = vrcp.f32 %v449_v29 }
 0x186   : > { %v718_v30 = vpop.eup %717 }
 0x187   : > { %v453_v32 = vmul.f32 %v718_v30, %v441_v25 }
 0x189   : > { %v454_v33 = vadd.f32 %v453_v32, %v452_v31 }
 0x18b   : > { %455 = vst [vmem:[%s262_s13] sm:$0xff] %v454_v33 }
 0x18c   : > { %820 = shalt.err (!%p817_p1)
}
 0x18d   : > { %s821_s24 = scalar_lea.hbm %s1123_s7, 128  ;;  %s825_s9 = scalar_lea.hbm %s1171_s4, 256 }
 0x18e   : > { %p822_p5 = scmp.ne.s32.totalorder %s1123_s7, %s821_s24  ;;  %p826_p7 = scmp.lt.u32.totalorder %s1123_s7, %s1171_s4 }
 0x18f   : > { %p827_p4 = scmp.lt.u32.totalorder %s825_s9, %s821_s24  ;;  %p829_p9 = scmp.lt.u32.totalorder %s821_s24, %s1123_s7 }
 0x190   : > { %p823_p11 = pnand %p822_p5, %p1188_p12 }
 0x191   : > { %p828_p10 = por %p827_p4, %p826_p7 }
 0x192   : > { %p824_p8 = pneg %p823_p11 }
 0x193   : > { %p830_p13 = por %p829_p9, %p828_p10 }
 0x195   : > { %p831_p6 = pnand %p830_p13, %p824_p8 }
 0x197   : > { %834 = shalt.err (!%p831_p6)
}
 0x198   : > { %641 = dma.vmem_to_hbm [thread:$0]  (%p1188_p12), %s1125_s8, 128, %s1123_s7, %s457_s20  }
 0x199 PF: > { %s482_s10 = sand.u32 1, %s865_s15   ;;  %p1189_p2 = scmp.ne.s32.totalorder %s1180_s5, 0 }
 0x19a   : > { %p1190_p0 = scmp.ge.s32.totalorder %s877_s18, 2  ;;  %s483_s12 = scalar_lea.sflag [#allocation4], %s482_s10 }
 0x19c   : > { %p655_p3 = pnand %p1190_p0, %p1189_p2 }
 0x19e   : > { %860 = dma.done.wait (!%p655_p3), %s483_s12, 128  }
 0x19f   : > { %862 = vsyncadd (!%p655_p3), %s483_s12, 4294967168  ;;  %p18_p1 = scmp.ge.s32.totalorder %s931_s19, 4   ;;  %s1191_s15 = smov %s869_s16 }
 0x1a0   : > { %s1192_s16 = smov %s873_s17  ;;  %s1193_s17 = smov %s942_s22 }
 0x1a1   : > { %s1194_s18 = smov %s931_s19  ;;  %20 = sbr.rel (!%p18_p1) target bundleno = 6 (0x6), region = 98 }
 0x1a8   :  { %488 = vsyncpa [#allocation3], 1 }
 0x1a9   :  { %490 = vsyncpa [#allocation3 + $0x1], 1 }
 0x1aa   :  { %491 = vsyncpa [#allocation6], 1 }
 0x1ab   :  { %493 = vsyncpa [#allocation6 + $0x1], 1 }
 0x1ac   :  { %494 = vsyncpa [#allocation4], 1 }
 0x1ad   :  { %496 = vsyncpa [#allocation4 + $0x1], 1 }

</bundles_post_ra>
